<compile_context>
chip_gen: v7x
topology: tpu7x:2x2x1
jax: 0.10.0
libtpu: 0.0.40
codegen_flags: <defaults>
</compile_context>

<pallas_src>
import jax
import jax.numpy as jnp
from jax.experimental import pallas as pl
from jax.experimental.pallas import tpu as pltpu


def _mean_pooling_kernel(hidden_ref, mask_ref, inv_ref, out_ref):
    s = pl.program_id(2)  # sequence (reduction) axis — innermost grid axis

    @pl.when(s == 0)
    def _():
        out_ref[...] = jnp.zeros_like(out_ref)

    # Native-dtype hidden DMA, f32 accumulation directly into the resident output block.
    h = hidden_ref[...].astype(jnp.float32)      # (bt, st, ht); no-op cast for f32 inputs
    m = mask_ref[...][:, :, None]                # (bt, st, 1) f32 (cast hoisted to wrapper)
    out_ref[...] += jnp.sum(h * m, axis=1)       # (bt, ht) partial masked sum
    # TODO(synk): for bf16 inputs on v7x a dot_general (MXU) contraction over s would avoid the
    # mask lane->sublane relayout and keep the kernel DMA-bound; kept on the VPU path here so the
    # f32 reference precision is preserved without multi-pass precision=HIGHEST matmuls.

    @pl.when(s == pl.num_programs(2) - 1)
    def _():
        # inv_ref = 1 / clamp(sum(mask), 1e-9), hoisted to the wrapper; broadcasts over lanes.
        out_ref[...] *= inv_ref[...]


def _largest_aligned_divisor(dim, max_tile, align):
    """Largest t <= max_tile with t % align == 0 and dim % t == 0 (None if no such t)."""
    t = (min(max_tile, dim) // align) * align
    while t >= align:
        if dim % t == 0:
            return t
        t -= align
    return None


def mean_pooling(last_hidden_state, attention_mask, *, block_b=8, hidden_block_bytes=None):
    B, S, H = last_hidden_state.shape
    assert attention_mask.shape == (B, S)
    itemsize = last_hidden_state.dtype.itemsize

    # Hoisted (tiny) wrapper-side ops: f32 mask + 1/clamp(sum(mask), 1e-9)  (matches torch.clamp).
    mask_f = attention_mask.astype(jnp.float32)                                    # (B, S)
    inv_len = 1.0 / jnp.maximum(jnp.sum(mask_f, axis=1, keepdims=True), 1e-9)      # (B, 1)

    # ---- generation-aware VMEM budget -------------------------------------------------------
    try:
        vmem_cap = int(pltpu.get_tpu_info().vmem_capacity_bytes)
        vmem_limit = min(vmem_cap * 3 // 4, 96 * 1024 * 1024)   # ~48 MiB on v7x, 96 MiB on v5e/v6e
    except Exception:
        vmem_limit = 48 * 1024 * 1024                           # safe on every generation
    if hidden_block_bytes is None:
        # double-buffered hidden blocks (2x this) stay well inside the limit
        hidden_block_bytes = min(16 * 1024 * 1024, vmem_limit * 2 // 5)

    # ---- tile selection: exact divisors only (no padding pass, no ragged OOB tiles) ---------
    bt = B if B <= block_b else (_largest_aligned_divisor(B, block_b, 8) or B)
    nb = B // bt

    ht = H
    if nb < 2 and H % 256 == 0:
        ht = H // 2            # ensure >= 2 "parallel" output tiles so both v7x TCs get work
    while bt * 128 * ht * itemsize > hidden_block_bytes and ht % 256 == 0:
        ht //= 2               # keep even a minimal (st=128) hidden block inside the budget
    nh = H // ht

    max_st = max(128, (hidden_block_bytes // (bt * ht * itemsize)) // 128 * 128)
    st = S if S <= max_st else (_largest_aligned_divisor(S, max_st, 128) or S)
    ns = S // st

    grid = (nb, nh, ns)        # reduction (seq) axis LAST

    out = pl.pallas_call(
        _mean_pooling_kernel,
        out_shape=jax.ShapeDtypeStruct((B, H), jnp.float32),
        grid_spec=pltpu.PrefetchScalarGridSpec(
            num_scalar_prefetch=0,
            grid=grid,
            in_specs=[
                pl.BlockSpec((bt, st, ht), lambda b, h, s: (b, s, h)),   # hidden (contiguous rows)
                pl.BlockSpec((bt, st), lambda b, h, s: (b, s)),          # f32 mask
                pl.BlockSpec((bt, 1), lambda b, h, s: (b, 0)),           # 1 / clamp(len)
            ],
            # Same output block for every s step -> resident f32 accumulator tile.
            out_specs=pl.BlockSpec((bt, ht), lambda b, h, s: (b, h)),
        ),
        compiler_params=pltpu.CompilerParams(
            dimension_semantics=("parallel", "parallel", "arbitrary"),
            vmem_limit_bytes=vmem_limit,
        ),
    )(last_hidden_state, mask_f, inv_len)

    return out


def _reference(last_hidden_state, attention_mask):
    m = attention_mask.astype(jnp.float32)[:, :, None]
    s = jnp.sum(last_hidden_state.astype(jnp.float32) * m, axis=1)
    d = jnp.maximum(jnp.sum(m, axis=1), 1e-9)
    return s / d


if __name__ == "__main__":
    key = jax.random.PRNGKey(0)
    k1, k2, k3 = jax.random.split(key, 3)

    # --- Test 1: small single-block shape (B, S, H) = (2, 8, 32) ---
    B, S, H = 2, 8, 32
    hidden1 = jax.random.normal(k1, (B, S, H), dtype=jnp.float32)
    lengths1 = jnp.array([8, 5], dtype=jnp.int32)
    mask1 = (jnp.arange(S)[None, :] < lengths1[:, None]).astype(jnp.int32)
    out1 = jax.block_until_ready(mean_pooling(hidden1, mask1))
    assert out1.shape == (B, H)
    assert jnp.allclose(out1, _reference(hidden1, mask1), atol=1e-5, rtol=1e-5)

    # --- Test 2: tiled path — 3 seq (reduction) tiles and 2 hidden tiles (forced via a small
    #     block-byte budget); includes an all-pad row exercising the 1e-9 clamp ---
    B2, S2, H2 = 4, 384, 256
    hidden2 = jax.random.normal(k2, (B2, S2, H2), dtype=jnp.float32)
    lengths2 = jnp.array([384, 200, 7, 0], dtype=jnp.int32)
    mask2 = (jnp.arange(S2)[None, :] < lengths2[:, None]).astype(jnp.int32)
    out2 = jax.block_until_ready(
        mean_pooling(hidden2, mask2, hidden_block_bytes=256 * 1024))
    assert out2.shape == (B2, H2)
    assert jnp.allclose(out2, _reference(hidden2, mask2), atol=1e-5, rtol=1e-5)

    # --- Test 3: multiple batch blocks (B=16 -> bt=8, two parallel batch tiles) ---
    B3, S3, H3 = 16, 256, 256
    hidden3 = jax.random.normal(k3, (B3, S3, H3), dtype=jnp.float32)
    lengths3 = (jnp.arange(B3, dtype=jnp.int32) * 16) % (S3 + 1)   # includes a zero-length row
    mask3 = (jnp.arange(S3)[None, :] < lengths3[:, None]).astype(jnp.int32)
    out3 = jax.block_until_ready(mean_pooling(hidden3, mask3))
    assert out3.shape == (B3, H3)
    assert jnp.allclose(out3, _reference(hidden3, mask3), atol=1e-5, rtol=1e-5)

    print("KERNEL_OK")
</pallas_src>

<mosaic_0001>
module attributes {stable_mosaic.version = 11 : i64} {
  func.func @_mean_pooling_kernel(%arg0: i32, %arg1: i32, %arg2: i32, %arg3: memref<2x8x32xf32, #tpu.memory_space<vmem>>, %arg4: memref<2x8xf32, #tpu.memory_space<vmem>>, %arg5: memref<2x1xf32, #tpu.memory_space<vmem>>, %arg6: memref<2x32xf32, #tpu.memory_space<vmem>>) attributes {dimension_semantics = [#tpu.dimension_semantics<parallel>, #tpu.dimension_semantics<parallel>, #tpu.dimension_semantics<arbitrary>], iteration_bounds = array<i64: 1, 1, 1>, scalar_prefetch = 0 : i64, scratch_operands = 0 : i64, tpu.core_type = #tpu.core_type<tc>, window_params = [{transform_indices = @transform_0, window_bounds = array<i64: 2, 8, 32>}, {transform_indices = @transform_1, window_bounds = array<i64: 2, 8>}, {transform_indices = @transform_2, window_bounds = array<i64: 2, 1>}, {transform_indices = @transform_3, window_bounds = array<i64: 2, 32>}]} {
    %c0_i32 = arith.constant 0 : i32
    %0 = arith.cmpi eq, %arg2, %c0_i32 : i32
    %1 = arith.extui %0 : i1 to i32
    %c0_i32_0 = arith.constant 0 : i32
    %2 = arith.cmpi ne, %1, %c0_i32_0 : i32
    scf.if %2 {
      %cst_11 = arith.constant 0.000000e+00 : f32
      %15 = vector.broadcast %cst_11 : f32 to vector<2x32xf32>
      %c0_12 = arith.constant 0 : index
      %c0_13 = arith.constant 0 : index
      %16 = vector.load %arg6[%c0_12, %c0_13] : memref<2x32xf32, #tpu.memory_space<vmem>>, vector<2x32xf32>
      tpu.vector_store %arg6[%c0_12, %c0_13], %15 {strides = array<i32>} : memref<2x32xf32, #tpu.memory_space<vmem>>, vector<2x32xf32>,
    } else {
    }
    %c0 = arith.constant 0 : index
    %c0_1 = arith.constant 0 : index
    %c0_2 = arith.constant 0 : index
    %3 = vector.load %arg3[%c0, %c0_1, %c0_2] : memref<2x8x32xf32, #tpu.memory_space<vmem>>, vector<2x8x32xf32>
    %c0_3 = arith.constant 0 : index
    %c0_4 = arith.constant 0 : index
    %4 = vector.load %arg4[%c0_3, %c0_4] : memref<2x8xf32, #tpu.memory_space<vmem>>, vector<2x8xf32>
    %5 = vector.shape_cast %4 : vector<2x8xf32> to vector<2x8x1xf32>
    %c0_5 = arith.constant 0 : index
    %c0_6 = arith.constant 0 : index
    %6 = vector.load %arg6[%c0_5, %c0_6] : memref<2x32xf32, #tpu.memory_space<vmem>>, vector<2x32xf32>
    %7 = vector.broadcast %5 : vector<2x8x1xf32> to vector<2x8x32xf32>
    %8 = arith.mulf %3, %7 : vector<2x8x32xf32>
    %cst = arith.constant dense<0.000000e+00> : vector<2x32xf32>
    %9 = vector.multi_reduction <add>, %8, %cst [1] : vector<2x8x32xf32> to vector<2x32xf32>
    %10 = arith.addf %6, %9 : vector<2x32xf32>
    %c0_7 = arith.constant 0 : index
    %c0_8 = arith.constant 0 : index
    %11 = vector.load %arg6[%c0_7, %c0_8] : memref<2x32xf32, #tpu.memory_space<vmem>>, vector<2x32xf32>
    tpu.vector_store %arg6[%c0_7, %c0_8], %10 {strides = array<i32>} : memref<2x32xf32, #tpu.memory_space<vmem>>, vector<2x32xf32>,
    %c0_i32_9 = arith.constant 0 : i32
    %12 = arith.cmpi eq, %arg2, %c0_i32_9 : i32
    %13 = arith.extui %12 : i1 to i32
    %c0_i32_10 = arith.constant 0 : i32
    %14 = arith.cmpi ne, %13, %c0_i32_10 : i32
    scf.if %14 {
      %c0_11 = arith.constant 0 : index
      %c0_12 = arith.constant 0 : index
      %15 = vector.load %arg6[%c0_11, %c0_12] : memref<2x32xf32, #tpu.memory_space<vmem>>, vector<2x32xf32>
      %c0_13 = arith.constant 0 : index
      %c0_14 = arith.constant 0 : index
      %16 = vector.load %arg5[%c0_13, %c0_14] : memref<2x1xf32, #tpu.memory_space<vmem>>, vector<2x1xf32>
      %17 = vector.broadcast %16 : vector<2x1xf32> to vector<2x32xf32>
      %18 = arith.mulf %15, %17 : vector<2x32xf32>
      %c0_15 = arith.constant 0 : index
      %c0_16 = arith.constant 0 : index
      %19 = vector.load %arg6[%c0_15, %c0_16] : memref<2x32xf32, #tpu.memory_space<vmem>>, vector<2x32xf32>
      tpu.vector_store %arg6[%c0_15, %c0_16], %18 {strides = array<i32>} : memref<2x32xf32, #tpu.memory_space<vmem>>, vector<2x32xf32>,
    } else {
    }
    return
  }
  func.func @transform_0(%arg0: i32, %arg1: i32, %arg2: i32) -> (i32, i32, i32) {
    %c0_i32 = arith.constant 0 : i32
    return %arg0, %arg2, %arg1 : i32, i32, i32
  }
  func.func @transform_1(%arg0: i32, %arg1: i32, %arg2: i32) -> (i32, i32) {
    %c0_i32 = arith.constant 0 : i32
    return %arg0, %arg2 : i32, i32
  }
  func.func @transform_2(%arg0: i32, %arg1: i32, %arg2: i32) -> (i32, i32) {
    %c0_i32 = arith.constant 0 : i32
    %c0_i32_0 = arith.constant 0 : i32
    return %arg0, %c0_i32 : i32, i32
  }
  func.func @transform_3(%arg0: i32, %arg1: i32, %arg2: i32) -> (i32, i32) {
    %c0_i32 = arith.constant 0 : i32
    return %arg0, %arg1 : i32, i32
  }
}

</mosaic_0001>

<bundles_post_ra>
// kernel: tpu_custom_call.1
= control target key start
LH: loop header
LB: loop body
LE: loop exit
PB: predicated region body
PF: predicated region fallthrough
CT: control target
= control target key end

     0   :  { %8 = vsyncpa [#allocation3], 0  ;;  %s220_s0 = inlined_call_operand.hbm [shape: f32[2,8,32], index: 0, kind: input, shape index: {}]   ;;  %s221_s1 = inlined_call_operand.vmem [shape: f32[2,8], index: 1, kind: input, shape index: {}]   ;;  %s222_s2 = inlined_call_operand.vmem [shape: f32[2,1], index: 2, kind: input, shape index: {}]   ;;  %s223_s3 = inlined_call_operand.hbm [shape: f32[2,32], index: 3, kind: output, shape index: {}]  }
   0x1   :  { %9 = vsyncpa [#allocation4], 0  ;;  %s161_s12 = smov [#allocation2]   ;;  %s113_s16 = scalar_lea.hbm %s220_s0, 256 }
   0x2   :  { %s15_s13 = sshll.u32 %s161_s12, 4  ;;  %p114_p0 = scmp.ne.s32.totalorder %s220_s0, %s113_s16  ;;  %s16_s13 = int_to_ptr.vmem [resolvable:$true] %s15_s13 }
   0x3   :  { %p117_p1 = scmp.lt.u32.totalorder %s113_s16, %s220_s0 }
   0x5   :  { %p119_p2 = pnand %p117_p1, %p114_p0 }
   0x7   :  { %122 = shalt.err (!%p119_p2)
}
   0x8   :  { %s123_s21 = scalar_lea.vmem %s16_s13, 256  ;;  %p128_p4 = scmp.lt.s32.totalorder %s16_s13, %s16_s13 }
   0x9   :  { %p124_p3 = scmp.ne.s32.totalorder %s16_s13, %s123_s21  ;;  %p129_p5 = scmp.lt.s32.totalorder %s123_s21, %s123_s21 }
   0xb   :  { %p130_p6 = por %p129_p5, %p128_p4 }
   0xd   :  { %p131_p7 = pnand %p130_p6, %p124_p3 }
   0xf   :  { %134 = shalt.err (!%p131_p7)
}
  0x10   :  { %s162_s22 = smov 128   ;;  %s163_s23 = smov 8  }
  0x11   :  { %21 = dma.hbm_to_vmem [thread:$0]  %s220_s0, 256, %s16_s13, [#allocation3], %s162_s22, %s162_s22, %s163_s23  }
  0x12   :  { %157 = dma.done.wait [#allocation3], 256  }
  0x13   :  { %158 = vsyncadd [#allocation3], 4294967040  ;;  %v38_v0 = vlaneseq  ;;  %v164_v1 = vmov 0   ;;  %v37_v5 = vld [vmem:[%s221_s1] sm:$0x3]  ;;  %vm33_vm0 = vcmask 254976  }
  0x14   :  { %111 = vset.pattern.permute.xlu1 %v164_v1  ;;  %112 = vset.pattern.permute.xlu0 %v164_v1  ;;  %v82_v6 = vld [vmem:[%s222_s2] sm:$0x3]  ;;  %v165_v8 = vmov 0.0   ;;  %vm55_vm1 = vcmask 261120   ;;  %v36_v13 = vld [vmem:[#allocation2 + $0x8] sm:$0xff]  ;;  %vm72_vm2 = vcmask 1041409  }
  0x15   :  { %v39_v2 = vshrl.u32 %v38_v0, 7  ;;  %85 = vperm.xlu1 %111, %v82_v6   ;;  %34 = vst.msk [vmem:[#allocation5] sm:$0x3] %vm33_vm0, %v165_v8  ;;  %v35_v10 = vld [vmem:[#allocation2] sm:$0xff]  ;;  %s166_s0 = smov [#allocation5]  }
  0x16   :  { %s96_s1 = sshll.u32 %s166_s0, 4  ;;  %s97_s1 = int_to_ptr.vmem [resolvable:$true] %s96_s1 }
  0x17   :  { %v40_v3 = vsub.s32 0, %v39_v2  ;;  %v47_v4 = vsub.s32 1, %v39_v2  ;;  %s135_s2 = scalar_lea.vmem %s97_s1, 32  ;;  %p140_p9 = scmp.lt.s32.totalorder %s97_s1, %s97_s1 }
  0x18   :  { %p136_p8 = scmp.ne.s32.totalorder %s97_s1, %s135_s2  ;;  %p141_p10 = scmp.lt.s32.totalorder %s135_s2, %s135_s2 }
  0x19   :  { %v41_v7 = vrot.slane %v37_v5, %v40_v3  ;;  %v48_v9 = vrot.slane %v37_v5, %v47_v4 }
  0x1a   :  { %p142_p11 = por %p141_p10, %p140_p9 }
  0x1b   :  { %43 = vbcast.lane.b32.xlu0 %v41_v7, 256 }
  0x1c   :  { %v52_v29 = vld [vmem:[#allocation5] sm:$0x3]  ;;  %p143_p12 = pnand %p142_p11, %p136_p8 }
  0x1f   :  { %50 = vbcast.lane.b32.xlu0 %v48_v9, 256 }
  0x8d   :  { %v44_v11 = vpop.permute.xlu0 %43 }
  0x8e   :  { %v53_v12 = vmul.f32 %v44_v11, %v35_v10 }
  0x90   :  { %v56_v14 = vsel %vm55_vm1, %v53_v12, 0.0 }
  0x91   :  { %v57_v15 = vrot.slane %v56_v14, 4  ;;  %v51_v16 = vpop.permute.xlu0 %50 }
  0x92   :  { %v54_v17 = vmul.f32 %v51_v16, %v36_v13 }
  0x93   :  { %v58_v18 = vadd.f32 %v57_v15, %v56_v14 }
  0x94   :  { %v63_v19 = vsel %vm55_vm1, %v54_v17, 0.0  ;;  %v86_v33 = vpop.permute.xlu1 %85 }
  0x95   :  { %v59_v20 = vrot.slane %v58_v18, 2  ;;  %v64_v21 = vrot.slane %v63_v19, 4 }
  0x97   :  { %v60_v22 = vadd.f32 %v59_v20, %v58_v18  ;;  %v65_v23 = vadd.f32 %v64_v21, %v63_v19 }
  0x99   :  { %v66_v24 = vrot.slane %v65_v23, 2  ;;  %v61_v25 = vrot.slane %v60_v22, 1 }
  0x9b   :  { %v67_v26 = vadd.f32 %v66_v24, %v65_v23  ;;  %v62_v28 = vadd.f32 %v61_v25, %v60_v22 }
  0x9d   :  { %v68_v27 = vrot.slane %v67_v26, 1 }
  0x9f   :  { %v69_v30 = vadd.f32 %v68_v27, %v67_v26 }
  0xa1   :  { %v73_v31 = vsel %vm72_vm2, %v69_v30, %v62_v28 }
  0xa2   :  { %v75_v32 = vadd.f32 %v73_v31, %v52_v29 }
  0xa4   :  { %77 = vst.msk [vmem:[#allocation5] sm:$0x3] %vm33_vm0, %v75_v32 }
  0xab   :  { %v81_v34 = vld [vmem:[#allocation5] sm:$0x3] }
  0xac   :  { %v88_v35 = vmul.f32 %v86_v33, %v81_v34 }
  0xae   :  { %89 = vst.msk [vmem:[#allocation5] sm:$0x3] %vm33_vm0, %v88_v35 }
  0xaf   :  { %146 = shalt.err (!%p143_p12)
}
  0xb0   :  { %s147_s5 = scalar_lea.hbm %s223_s3, 32 }
  0xb1   :  { %p148_p13 = scmp.ne.s32.totalorder %s223_s3, %s147_s5  ;;  %p151_p0 = scmp.lt.u32.totalorder %s147_s5, %s223_s3 }
  0xb3   :  { %p153_p1 = pnand %p151_p0, %p148_p13 }
  0xb5   :  { %156 = shalt.err (!%p153_p1)
}
  0xb6   :  { %99 = dma.vmem_to_hbm [thread:$0]  %s97_s1, 32, %s223_s3, [#allocation4]  }
  0xb7   :  { %159 = dma.done.wait [#allocation4], 32  }
  0xb8   :  { %160 = vsyncadd [#allocation4], 4294967264 }
  0xb9   :  { %103 = vsyncpa [#allocation3], 1 }
  0xba   :  { %104 = vsyncpa [#allocation4], 1 }

</bundles_post_ra>
